<compile_context>
chip_gen: v5e
topology: v5e:2x2
jax: 0.10.0
libtpu: 0.0.40
codegen_flags: <defaults>
</compile_context>

<pallas_src>
import jax
import jax.numpy as jnp
from jax.experimental import pallas as pl
from jax.experimental.pallas import tpu as pltpu

EMBED_DIM = 32
HEAD_NUM = 4
HEAD_DIM = EMBED_DIM // HEAD_NUM          # 8
FF_DIM = 4 * EMBED_DIM                    # 128
BLOCK_SIZE = 8                            # max sequence length (causal mask)
SCALE = HEAD_DIM ** 0.5
LN_EPS = 1e-5

# ---- packed-parameter slab layout ------------------------------------------
# W slab (EMBED_DIM, 384):
#   per head h (stride 64 lanes, h = 0..3), base = h*64:
#     [base+ 0 : base+ 8)  wq_h * (1/SCALE)
#     [base+ 8 : base+16)  wk_h
#     [base+16 : base+48)  wvo_h = wv_h @ wo[h*8:(h+1)*8, :]   (Wo pre-folded)
#     [base+48 : base+64)  zero padding
#   [256 : 384)            w1  (C, FF)
HEAD_STRIDE = 64
OFF_W1 = 256
W_SLAB_W = 384
# V slab (8, 256):
#   row 0, lanes [0:128)   b1 (FF-wide bias)
#   rows 1..6, lanes [0:C) g1, be1, g2, be2, bo, b2p (= b2 @ wp + bp)
#   rows 0..7, lanes [128:128+T)  additive causal bias (0 / -1e30)
V_SLAB_W = 256
OFF_BIAS = 128


def _layernorm(v, gamma, beta):
    mu = jnp.mean(v, axis=-1, keepdims=True)
    var = jnp.mean(jnp.square(v - mu), axis=-1, keepdims=True)
    return (v - mu) * jax.lax.rsqrt(var + LN_EPS) * gamma + beta


def block_kernel(x_ref, w_ref, w2p_ref, v_ref, out_ref):
    bblk, T, C = x_ref.shape
    N = bblk * T

    x = x_ref[...].reshape(N, C)              # (N, C) flattened row slab
    W = w_ref[...]                            # (C, 384) weight slab
    V = v_ref[...]                            # (8, 256) vector slab
    w2p = w2p_ref[...]                        # (FF, C) folded w2 @ wp

    wqkv = W[:, :HEAD_NUM * HEAD_STRIDE]                  # (C, 256) fused
    w1 = W[:, OFF_W1:OFF_W1 + FF_DIM]                     # (C, FF)
    b1 = V[0, :FF_DIM]                                    # (FF,)
    g1, be1 = V[1, :C], V[2, :C]
    g2, be2 = V[3, :C], V[4, :C]
    bo, b2p = V[5, :C], V[6, :C]
    bias = V[0:T, OFF_BIAS:OFF_BIAS + T]                  # (T, T) 0 / -1e30

    # ---- multi-head causal self-attention on norm1(x) ----
    h = _layernorm(x, g1, be1)
    qkv = jnp.dot(h, wqkv, preferred_element_type=jnp.float32)   # (N, 256)

    # Fold heads into the batch dim: 4 wide (64-lane) slices + one leading-
    # axis concat -> (H*bblk, T, 64), then cheap lane sub-slices for q/k/vo.
    per_head = [
        qkv[:, hh * HEAD_STRIDE:(hh + 1) * HEAD_STRIDE].reshape(bblk, T, HEAD_STRIDE)
        for hh in range(HEAD_NUM)
    ]
    qkv_h = jnp.concatenate(per_head, axis=0)             # (H*bblk, T, 64)
    qh = qkv_h[:, :, 0:HEAD_DIM]                          # (H*bblk, T, Dh)
    kh = qkv_h[:, :, HEAD_DIM:2 * HEAD_DIM]               # (H*bblk, T, Dh)
    voh = qkv_h[:, :, 2 * HEAD_DIM:2 * HEAD_DIM + C]      # (H*bblk, T, C) Wo-folded values

    # Single batched score einsum; scale already folded into Wq.
    s = jnp.einsum('btd,bsd->bts', qh, kh,
                   preferred_element_type=jnp.float32)    # (H*bblk, T, T)
    s = s + bias                                          # additive causal mask
    s = s - jnp.max(s, axis=-1, keepdims=True)
    p = jnp.exp(s)
    denom = jnp.sum(p, axis=-1, keepdims=True)
    r = pl.reciprocal(denom, approx=True)                 # EUP vrcp (free slot)
    r = r * (2.0 - denom * r)                             # 1 Newton step -> f32
    p = p * r

    # Context einsum already yields the per-head Wo-projected outputs; the
    # output projection reduces to a sum over the head groups.
    o = jnp.einsum('bts,bsc->btc', p, voh,
                   preferred_element_type=jnp.float32)    # (H*bblk, T, C)
    attn = o.reshape(HEAD_NUM, N, C).sum(axis=0)          # (N, C)

    x = x + attn + bo                                     # residual 1

    # ---- feed-forward on norm2(x) (tail w2 @ wp pre-folded into w2p) ----
    h2 = _layernorm(x, g2, be2)
    f = jnp.dot(h2, w1, preferred_element_type=jnp.float32) + b1
    f = jnp.maximum(f, 0.0)                               # ReLU
    f = jnp.dot(f, w2p, preferred_element_type=jnp.float32) + b2p
    out_ref[...] = (x + f).reshape(bblk, T, C)            # residual 2


def make_params(key):
    ks = jax.random.split(key, 12)
    s = 0.02
    return {
        "wq": s * jax.random.normal(ks[0], (EMBED_DIM, EMBED_DIM), jnp.float32),
        "wk": s * jax.random.normal(ks[1], (EMBED_DIM, EMBED_DIM), jnp.float32),
        "wv": s * jax.random.normal(ks[2], (EMBED_DIM, EMBED_DIM), jnp.float32),
        "wo": s * jax.random.normal(ks[3], (EMBED_DIM, EMBED_DIM), jnp.float32),
        "bo": s * jax.random.normal(ks[4], (1, EMBED_DIM), jnp.float32),
        "w1": s * jax.random.normal(ks[5], (EMBED_DIM, FF_DIM), jnp.float32),
        "b1": s * jax.random.normal(ks[6], (1, FF_DIM), jnp.float32),
        "w2": s * jax.random.normal(ks[7], (FF_DIM, EMBED_DIM), jnp.float32),
        "b2": s * jax.random.normal(ks[8], (1, EMBED_DIM), jnp.float32),
        "wp": s * jax.random.normal(ks[9], (EMBED_DIM, EMBED_DIM), jnp.float32),
        "bp": s * jax.random.normal(ks[10], (1, EMBED_DIM), jnp.float32),
        "g1": jnp.ones((1, EMBED_DIM), jnp.float32),
        "be1": jnp.zeros((1, EMBED_DIM), jnp.float32),
        "g2": jnp.ones((1, EMBED_DIM), jnp.float32),
        "be2": jnp.zeros((1, EMBED_DIM), jnp.float32),
    }


def _pack_params(p):
    """Fuse + pack the 15 small tensors into 3 slabs (done once per call)."""
    inv_scale = 1.0 / SCALE
    w2p = p["w2"] @ p["wp"]                               # (FF, C)
    b2p = p["b2"] @ p["wp"] + p["bp"]                     # (1, C)

    w_slab = jnp.zeros((EMBED_DIM, W_SLAB_W), jnp.float32)
    for h in range(HEAD_NUM):
        cs = slice(h * HEAD_DIM, (h + 1) * HEAD_DIM)
        base = h * HEAD_STRIDE
        wvo_h = p["wv"][:, cs] @ p["wo"][cs, :]           # (C, C) Wo folded into Wv
        w_slab = w_slab.at[:, base:base + HEAD_DIM].set(p["wq"][:, cs] * inv_scale)
        w_slab = w_slab.at[:, base + HEAD_DIM:base + 2 * HEAD_DIM].set(p["wk"][:, cs])
        w_slab = w_slab.at[:, base + 2 * HEAD_DIM:base + 2 * HEAD_DIM + EMBED_DIM].set(wvo_h)
    w_slab = w_slab.at[:, OFF_W1:OFF_W1 + FF_DIM].set(p["w1"])

    v_slab = jnp.zeros((8, V_SLAB_W), jnp.float32)
    v_slab = v_slab.at[0, :FF_DIM].set(p["b1"][0])
    v_slab = v_slab.at[1, :EMBED_DIM].set(p["g1"][0])
    v_slab = v_slab.at[2, :EMBED_DIM].set(p["be1"][0])
    v_slab = v_slab.at[3, :EMBED_DIM].set(p["g2"][0])
    v_slab = v_slab.at[4, :EMBED_DIM].set(p["be2"][0])
    v_slab = v_slab.at[5, :EMBED_DIM].set(p["bo"][0])
    v_slab = v_slab.at[6, :EMBED_DIM].set(b2p[0])
    causal = jnp.tril(jnp.ones((BLOCK_SIZE, BLOCK_SIZE), jnp.float32))
    add_bias = jnp.where(causal == 0, -1e30, 0.0).astype(jnp.float32)
    v_slab = v_slab.at[:BLOCK_SIZE, OFF_BIAS:OFF_BIAS + BLOCK_SIZE].set(add_bias)
    return w_slab, w2p, v_slab


def block_forward(x, p):
    B, T, C = x.shape
    assert T == BLOCK_SIZE and C == EMBED_DIM
    w_slab, w2p, v_slab = _pack_params(p)

    # Batch-slab sizing (perf review):
    #  * cap at 64 batches (512 rows/step) -> fills the 256-deep v6e/v7x MXU
    #    M pass and amortizes the ~0.35us/step grid overhead;
    #  * keep >= 2 grid steps whenever B >= 2 so both v7x TensorCores work;
    #  * pad B up to a multiple of bblk (slice output) instead of shrinking
    #    bblk to a divisor of B (no bblk=1 collapse for odd/prime B).
    MAX_BBLK = 64
    bblk = 1 if B < 2 else min(MAX_BBLK, B // 2)
    b_pad = pl.cdiv(B, bblk) * bblk
    x_in = x if b_pad == B else jnp.pad(x, ((0, b_pad - B), (0, 0), (0, 0)))
    grid = (b_pad // bblk,)

    out = pl.pallas_call(
        block_kernel,
        out_shape=jax.ShapeDtypeStruct((b_pad, T, C), jnp.float32),
        grid_spec=pltpu.PrefetchScalarGridSpec(
            num_scalar_prefetch=0,
            grid=grid,
            in_specs=[
                pl.BlockSpec((bblk, T, C), lambda b: (b, 0, 0)),
                pl.BlockSpec((EMBED_DIM, W_SLAB_W), lambda b: (0, 0)),
                pl.BlockSpec((FF_DIM, EMBED_DIM), lambda b: (0, 0)),
                pl.BlockSpec((8, V_SLAB_W), lambda b: (0, 0)),
            ],
            out_specs=pl.BlockSpec((bblk, T, C), lambda b: (b, 0, 0)),
        ),
        compiler_params=pltpu.CompilerParams(
            dimension_semantics=("parallel",)),
    )(x_in, w_slab, w2p, v_slab)
    return out if b_pad == B else out[:B]


block_forward_jit = jax.jit(block_forward)


def block_reference(x, p):
    def ln(v, g, b):
        mu = jnp.mean(v, axis=-1, keepdims=True)
        var = jnp.mean((v - mu) ** 2, axis=-1, keepdims=True)
        return (v - mu) * jax.lax.rsqrt(var + LN_EPS) * g + b

    B, T, C = x.shape
    h = ln(x, p["g1"][0], p["be1"][0])
    q = h @ p["wq"]
    k = h @ p["wk"]
    v = h @ p["wv"]
    qh = q.reshape(B, T, HEAD_NUM, HEAD_DIM).transpose(0, 2, 1, 3)
    kh = k.reshape(B, T, HEAD_NUM, HEAD_DIM).transpose(0, 2, 1, 3)
    vh = v.reshape(B, T, HEAD_NUM, HEAD_DIM).transpose(0, 2, 1, 3)
    scores = jnp.einsum("bhqd,bhkd->bhqk", qh, kh) / SCALE
    mask = jnp.tril(jnp.ones((T, T)))
    scores = jnp.where(mask == 0, -jnp.inf, scores)
    probs = jax.nn.softmax(scores, axis=-1)
    out = jnp.einsum("bhqk,bhkd->bhqd", probs, vh)
    out = out.transpose(0, 2, 1, 3).reshape(B, T, C)
    attn = out @ p["wo"] + p["bo"][0]
    x = x + attn
    h2 = ln(x, p["g2"][0], p["be2"][0])
    f = jnp.maximum(h2 @ p["w1"] + p["b1"][0], 0.0)
    f = f @ p["w2"] + p["b2"][0]
    f = f @ p["wp"] + p["bp"][0]
    return x + f


if __name__ == "__main__":
    key = jax.random.PRNGKey(0)
    kx, kp = jax.random.split(key)
    B, T, C = 2, BLOCK_SIZE, EMBED_DIM
    x = jax.random.normal(kx, (B, T, C), jnp.float32)
    params = make_params(kp)

    out = block_forward_jit(x, params)
    out = jax.block_until_ready(out)

    ref = block_reference(x, params)
    assert out.shape == (B, T, C)
    assert jnp.allclose(out, ref, atol=1e-4, rtol=1e-4), \
        f"max abs err {jnp.max(jnp.abs(out - ref))}"
    print("KERNEL_OK")
</pallas_src>

<mosaic_0001>
module attributes {stable_mosaic.version = 11 : i64} {
  func.func @block_kernel(%arg0: i32, %arg1: memref<1x8x32xf32, #tpu.memory_space<vmem>>, %arg2: memref<32x384xf32, #tpu.memory_space<vmem>>, %arg3: memref<128x32xf32, #tpu.memory_space<vmem>>, %arg4: memref<8x256xf32, #tpu.memory_space<vmem>>, %arg5: memref<1x8x32xf32, #tpu.memory_space<vmem>>) attributes {dimension_semantics = [#tpu.dimension_semantics<parallel>], iteration_bounds = array<i64: 2>, scalar_prefetch = 0 : i64, scratch_operands = 0 : i64, tpu.core_type = #tpu.core_type<tc>, window_params = [{transform_indices = @transform_0, window_bounds = array<i64: 1, 8, 32>}, {pipeline_mode = #tpu.pipeline_mode<synchronous>, transform_indices = @transform_1, window_bounds = array<i64: 32, 384>}, {pipeline_mode = #tpu.pipeline_mode<synchronous>, transform_indices = @transform_2, window_bounds = array<i64: 128, 32>}, {pipeline_mode = #tpu.pipeline_mode<synchronous>, transform_indices = @transform_3, window_bounds = array<i64: 8, 256>}, {transform_indices = @transform_4, window_bounds = array<i64: 1, 8, 32>}]} {
    %c0 = arith.constant 0 : index
    %c0_0 = arith.constant 0 : index
    %c0_1 = arith.constant 0 : index
    %0 = vector.load %arg1[%c0, %c0_0, %c0_1] : memref<1x8x32xf32, #tpu.memory_space<vmem>>, vector<1x8x32xf32>
    %1 = vector.shape_cast %0 : vector<1x8x32xf32> to vector<8x32xf32>
    %c0_2 = arith.constant 0 : index
    %c0_3 = arith.constant 0 : index
    %2 = vector.load %arg2[%c0_2, %c0_3] : memref<32x384xf32, #tpu.memory_space<vmem>>, vector<32x384xf32>
    %c0_4 = arith.constant 0 : index
    %c0_5 = arith.constant 0 : index
    %3 = vector.load %arg4[%c0_4, %c0_5] : memref<8x256xf32, #tpu.memory_space<vmem>>, vector<8x256xf32>
    %c0_6 = arith.constant 0 : index
    %c0_7 = arith.constant 0 : index
    %4 = vector.load %arg3[%c0_6, %c0_7] : memref<128x32xf32, #tpu.memory_space<vmem>>, vector<128x32xf32>
    %5 = vector.extract_strided_slice %2 {offsets = [0, 0], sizes = [32, 256], strides = [1, 1]} : vector<32x384xf32> to vector<32x256xf32>
    %6 = vector.extract_strided_slice %2 {offsets = [0, 256], sizes = [32, 128], strides = [1, 1]} : vector<32x384xf32> to vector<32x128xf32>
    %7 = vector.extract_strided_slice %3 {offsets = [0, 0], sizes = [1, 128], strides = [1, 1]} : vector<8x256xf32> to vector<1x128xf32>
    %8 = vector.shape_cast %7 : vector<1x128xf32> to vector<128xf32>
    %9 = vector.extract_strided_slice %3 {offsets = [1, 0], sizes = [1, 32], strides = [1, 1]} : vector<8x256xf32> to vector<1x32xf32>
    %10 = vector.shape_cast %9 : vector<1x32xf32> to vector<32xf32>
    %11 = vector.extract_strided_slice %3 {offsets = [2, 0], sizes = [1, 32], strides = [1, 1]} : vector<8x256xf32> to vector<1x32xf32>
    %12 = vector.shape_cast %11 : vector<1x32xf32> to vector<32xf32>
    %13 = vector.extract_strided_slice %3 {offsets = [3, 0], sizes = [1, 32], strides = [1, 1]} : vector<8x256xf32> to vector<1x32xf32>
    %14 = vector.shape_cast %13 : vector<1x32xf32> to vector<32xf32>
    %15 = vector.extract_strided_slice %3 {offsets = [4, 0], sizes = [1, 32], strides = [1, 1]} : vector<8x256xf32> to vector<1x32xf32>
    %16 = vector.shape_cast %15 : vector<1x32xf32> to vector<32xf32>
    %17 = vector.extract_strided_slice %3 {offsets = [5, 0], sizes = [1, 32], strides = [1, 1]} : vector<8x256xf32> to vector<1x32xf32>
    %18 = vector.shape_cast %17 : vector<1x32xf32> to vector<32xf32>
    %19 = vector.extract_strided_slice %3 {offsets = [6, 0], sizes = [1, 32], strides = [1, 1]} : vector<8x256xf32> to vector<1x32xf32>
    %20 = vector.shape_cast %19 : vector<1x32xf32> to vector<32xf32>
    %21 = vector.extract_strided_slice %3 {offsets = [0, 128], sizes = [8, 8], strides = [1, 1]} : vector<8x256xf32> to vector<8x8xf32>
    %cst = arith.constant dense<0.000000e+00> : vector<8xf32>
    %22 = vector.multi_reduction <add>, %1, %cst [1] : vector<8x32xf32> to vector<8xf32>
    %23 = vector.shape_cast %22 : vector<8xf32> to vector<8x1xf32>
    %cst_8 = arith.constant 3.200000e+01 : f32
    %24 = vector.broadcast %cst_8 : f32 to vector<8x1xf32>
    %25 = arith.divf %23, %24 : vector<8x1xf32>
    %26 = vector.broadcast %25 : vector<8x1xf32> to vector<8x32xf32>
    %27 = arith.subf %1, %26 : vector<8x32xf32>
    %28 = arith.mulf %27, %27 : vector<8x32xf32>
    %cst_9 = arith.constant dense<0.000000e+00> : vector<8xf32>
    %29 = vector.multi_reduction <add>, %28, %cst_9 [1] : vector<8x32xf32> to vector<8xf32>
    %30 = vector.shape_cast %29 : vector<8xf32> to vector<8x1xf32>
    %cst_10 = arith.constant 3.200000e+01 : f32
    %31 = vector.broadcast %cst_10 : f32 to vector<8x1xf32>
    %32 = arith.divf %30, %31 : vector<8x1xf32>
    %33 = vector.broadcast %25 : vector<8x1xf32> to vector<8x32xf32>
    %34 = arith.subf %1, %33 : vector<8x32xf32>
    %cst_11 = arith.constant 9.99999974E-6 : f32
    %35 = vector.broadcast %cst_11 : f32 to vector<8x1xf32>
    %36 = arith.addf %32, %35 : vector<8x1xf32>
    %37 = math.rsqrt %36 : vector<8x1xf32>
    %38 = vector.broadcast %37 : vector<8x1xf32> to vector<8x32xf32>
    %39 = arith.mulf %34, %38 : vector<8x32xf32>
    %40 = vector.shape_cast %10 : vector<32xf32> to vector<1x32xf32>
    %41 = vector.broadcast %40 : vector<1x32xf32> to vector<8x32xf32>
    %42 = arith.mulf %39, %41 : vector<8x32xf32>
    %43 = vector.shape_cast %12 : vector<32xf32> to vector<1x32xf32>
    %44 = vector.broadcast %43 : vector<1x32xf32> to vector<8x32xf32>
    %45 = arith.addf %42, %44 : vector<8x32xf32>
    %cst_12 = arith.constant dense<0.000000e+00> : vector<8x256xf32>
    %46 = tpu.matmul %45, %5, %cst_12 {dimension_numbers = #tpu.dot_dimension_numbers<[1], [0], [0], [1], [0, 0, 1, 1], [], []>} : vector<8x32xf32>, vector<32x256xf32>, vector<8x256xf32> -> vector<8x256xf32>
    %47 = vector.extract_strided_slice %46 {offsets = [0, 0], sizes = [8, 64], strides = [1, 1]} : vector<8x256xf32> to vector<8x64xf32>
    %48 = vector.shape_cast %47 : vector<8x64xf32> to vector<1x8x64xf32>
    %49 = vector.extract_strided_slice %46 {offsets = [0, 64], sizes = [8, 64], strides = [1, 1]} : vector<8x256xf32> to vector<8x64xf32>
    %50 = vector.shape_cast %49 : vector<8x64xf32> to vector<1x8x64xf32>
    %51 = vector.extract_strided_slice %46 {offsets = [0, 128], sizes = [8, 64], strides = [1, 1]} : vector<8x256xf32> to vector<8x64xf32>
    %52 = vector.shape_cast %51 : vector<8x64xf32> to vector<1x8x64xf32>
    %53 = vector.extract_strided_slice %46 {offsets = [0, 192], sizes = [8, 64], strides = [1, 1]} : vector<8x256xf32> to vector<8x64xf32>
    %54 = vector.shape_cast %53 : vector<8x64xf32> to vector<1x8x64xf32>
    %55 = tpu.concatenate %48, %50, %52, %54 in 0 : vector<1x8x64xf32>, vector<1x8x64xf32>, vector<1x8x64xf32>, vector<1x8x64xf32> -> vector<4x8x64xf32>
    %56 = vector.extract_strided_slice %55 {offsets = [0, 0, 0], sizes = [4, 8, 8], strides = [1, 1, 1]} : vector<4x8x64xf32> to vector<4x8x8xf32>
    %57 = vector.extract_strided_slice %55 {offsets = [0, 0, 8], sizes = [4, 8, 8], strides = [1, 1, 1]} : vector<4x8x64xf32> to vector<4x8x8xf32>
    %58 = vector.extract_strided_slice %55 {offsets = [0, 0, 16], sizes = [4, 8, 32], strides = [1, 1, 1]} : vector<4x8x64xf32> to vector<4x8x32xf32>
    "tpu.trace_start"() <{level = 10 : i32, message = "btd,bsd->bts"}> : () -> ()
    %cst_13 = arith.constant dense<0.000000e+00> : vector<4x8x8xf32>
    %59 = tpu.matmul %56, %57, %cst_13 {dimension_numbers = #tpu.dot_dimension_numbers<[2], [2], [1], [1], [0, 0, 0, 1, 1, 1], [0], [0]>} : vector<4x8x8xf32>, vector<4x8x8xf32>, vector<4x8x8xf32> -> vector<4x8x8xf32>
    "tpu.trace_stop"() : () -> ()
    %60 = vector.shape_cast %21 : vector<8x8xf32> to vector<1x8x8xf32>
    %61 = vector.broadcast %60 : vector<1x8x8xf32> to vector<4x8x8xf32>
    %62 = arith.addf %59, %61 : vector<4x8x8xf32>
    %cst_14 = arith.constant dense<0xFF800000> : vector<4x8xf32>
    %63 = vector.multi_reduction <maximumf>, %62, %cst_14 [2] : vector<4x8x8xf32> to vector<4x8xf32>
    %64 = vector.shape_cast %63 : vector<4x8xf32> to vector<4x8x1xf32>
    %65 = vector.broadcast %64 : vector<4x8x1xf32> to vector<4x8x8xf32>
    %66 = arith.subf %62, %65 : vector<4x8x8xf32>
    %67 = math.exp %66 : vector<4x8x8xf32>
    %cst_15 = arith.constant dense<0.000000e+00> : vector<4x8xf32>
    %68 = vector.multi_reduction <add>, %67, %cst_15 [2] : vector<4x8x8xf32> to vector<4x8xf32>
    %69 = vector.shape_cast %68 : vector<4x8xf32> to vector<4x8x1xf32>
    %70 = tpu.reciprocal %69 {approx = true} : vector<4x8x1xf32> -> vector<4x8x1xf32>
    %71 = arith.mulf %69, %70 : vector<4x8x1xf32>
    %cst_16 = arith.constant 2.000000e+00 : f32
    %72 = vector.broadcast %cst_16 : f32 to vector<4x8x1xf32>
    %73 = arith.subf %72, %71 : vector<4x8x1xf32>
    %74 = arith.mulf %70, %73 : vector<4x8x1xf32>
    %75 = vector.broadcast %74 : vector<4x8x1xf32> to vector<4x8x8xf32>
    %76 = arith.mulf %67, %75 : vector<4x8x8xf32>
    "tpu.trace_start"() <{level = 10 : i32, message = "bts,bsc->btc"}> : () -> ()
    %cst_17 = arith.constant dense<0.000000e+00> : vector<4x8x32xf32>
    %77 = tpu.matmul %76, %58, %cst_17 {dimension_numbers = #tpu.dot_dimension_numbers<[2], [1], [1], [2], [0, 0, 0, 1, 1, 2], [0], [0]>} : vector<4x8x8xf32>, vector<4x8x32xf32>, vector<4x8x32xf32> -> vector<4x8x32xf32>
    "tpu.trace_stop"() : () -> ()
    %cst_18 = arith.constant dense<0.000000e+00> : vector<8x32xf32>
    %78 = vector.multi_reduction <add>, %77, %cst_18 [0] : vector<4x8x32xf32> to vector<8x32xf32>
    %79 = arith.addf %1, %78 : vector<8x32xf32>
    %80 = vector.shape_cast %18 : vector<32xf32> to vector<1x32xf32>
    %81 = vector.broadcast %80 : vector<1x32xf32> to vector<8x32xf32>
    %82 = arith.addf %79, %81 : vector<8x32xf32>
    %cst_19 = arith.constant dense<0.000000e+00> : vector<8xf32>
    %83 = vector.multi_reduction <add>, %82, %cst_19 [1] : vector<8x32xf32> to vector<8xf32>
    %84 = vector.shape_cast %83 : vector<8xf32> to vector<8x1xf32>
    %cst_20 = arith.constant 3.200000e+01 : f32
    %85 = vector.broadcast %cst_20 : f32 to vector<8x1xf32>
    %86 = arith.divf %84, %85 : vector<8x1xf32>
    %87 = vector.broadcast %86 : vector<8x1xf32> to vector<8x32xf32>
    %88 = arith.subf %82, %87 : vector<8x32xf32>
    %89 = arith.mulf %88, %88 : vector<8x32xf32>
    %cst_21 = arith.constant dense<0.000000e+00> : vector<8xf32>
    %90 = vector.multi_reduction <add>, %89, %cst_21 [1] : vector<8x32xf32> to vector<8xf32>
    %91 = vector.shape_cast %90 : vector<8xf32> to vector<8x1xf32>
    %cst_22 = arith.constant 3.200000e+01 : f32
    %92 = vector.broadcast %cst_22 : f32 to vector<8x1xf32>
    %93 = arith.divf %91, %92 : vector<8x1xf32>
    %94 = vector.broadcast %86 : vector<8x1xf32> to vector<8x32xf32>
    %95 = arith.subf %82, %94 : vector<8x32xf32>
    %cst_23 = arith.constant 9.99999974E-6 : f32
    %96 = vector.broadcast %cst_23 : f32 to vector<8x1xf32>
    %97 = arith.addf %93, %96 : vector<8x1xf32>
    %98 = math.rsqrt %97 : vector<8x1xf32>
    %99 = vector.broadcast %98 : vector<8x1xf32> to vector<8x32xf32>
    %100 = arith.mulf %95, %99 : vector<8x32xf32>
    %101 = vector.shape_cast %14 : vector<32xf32> to vector<1x32xf32>
    %102 = vector.broadcast %101 : vector<1x32xf32> to vector<8x32xf32>
    %103 = arith.mulf %100, %102 : vector<8x32xf32>
    %104 = vector.shape_cast %16 : vector<32xf32> to vector<1x32xf32>
    %105 = vector.broadcast %104 : vector<1x32xf32> to vector<8x32xf32>
    %106 = arith.addf %103, %105 : vector<8x32xf32>
    %cst_24 = arith.constant dense<0.000000e+00> : vector<8x128xf32>
    %107 = tpu.matmul %106, %6, %cst_24 {dimension_numbers = #tpu.dot_dimension_numbers<[1], [0], [0], [1], [0, 0, 1, 1], [], []>} : vector<8x32xf32>, vector<32x128xf32>, vector<8x128xf32> -> vector<8x128xf32>
    %108 = vector.shape_cast %8 : vector<128xf32> to vector<1x128xf32>
    %109 = vector.broadcast %108 : vector<1x128xf32> to vector<8x128xf32>
    %110 = arith.addf %107, %109 : vector<8x128xf32>
    %cst_25 = arith.constant 0.000000e+00 : f32
    %111 = vector.broadcast %cst_25 : f32 to vector<8x128xf32>
    %112 = arith.maximumf %110, %111 : vector<8x128xf32>
    %cst_26 = arith.constant dense<0.000000e+00> : vector<8x32xf32>
    %113 = tpu.matmul %112, %4, %cst_26 {dimension_numbers = #tpu.dot_dimension_numbers<[1], [0], [0], [1], [0, 0, 1, 1], [], []>} : vector<8x128xf32>, vector<128x32xf32>, vector<8x32xf32> -> vector<8x32xf32>
    %114 = vector.shape_cast %20 : vector<32xf32> to vector<1x32xf32>
    %115 = vector.broadcast %114 : vector<1x32xf32> to vector<8x32xf32>
    %116 = arith.addf %113, %115 : vector<8x32xf32>
    %117 = arith.addf %82, %116 : vector<8x32xf32>
    %118 = vector.shape_cast %117 : vector<8x32xf32> to vector<1x8x32xf32>
    %c0_27 = arith.constant 0 : index
    %c0_28 = arith.constant 0 : index
    %c0_29 = arith.constant 0 : index
    %119 = vector.load %arg5[%c0_27, %c0_28, %c0_29] : memref<1x8x32xf32, #tpu.memory_space<vmem>>, vector<1x8x32xf32>
    tpu.vector_store %arg5[%c0_27, %c0_28, %c0_29], %118 {strides = array<i32>} : memref<1x8x32xf32, #tpu.memory_space<vmem>>, vector<1x8x32xf32>,
    return
  }
  func.func @transform_0(%arg0: i32) -> (i32, i32, i32) {
    %c0_i32 = arith.constant 0 : i32
    %c0_i32_0 = arith.constant 0 : i32
    %c0_i32_1 = arith.constant 0 : i32
    return %arg0, %c0_i32, %c0_i32_0 : i32, i32, i32
  }
  func.func @transform_1(%arg0: i32) -> (i32, i32) {
    %c0_i32 = arith.constant 0 : i32
    %c0_i32_0 = arith.constant 0 : i32
    %c0_i32_1 = arith.constant 0 : i32
    return %c0_i32, %c0_i32_0 : i32, i32
  }
  func.func @transform_2(%arg0: i32) -> (i32, i32) {
    %c0_i32 = arith.constant 0 : i32
    %c0_i32_0 = arith.constant 0 : i32
    %c0_i32_1 = arith.constant 0 : i32
    return %c0_i32, %c0_i32_0 : i32, i32
  }
  func.func @transform_3(%arg0: i32) -> (i32, i32) {
    %c0_i32 = arith.constant 0 : i32
    %c0_i32_0 = arith.constant 0 : i32
    %c0_i32_1 = arith.constant 0 : i32
    return %c0_i32, %c0_i32_0 : i32, i32
  }
  func.func @transform_4(%arg0: i32) -> (i32, i32, i32) {
    %c0_i32 = arith.constant 0 : i32
    %c0_i32_0 = arith.constant 0 : i32
    %c0_i32_1 = arith.constant 0 : i32
    return %arg0, %c0_i32, %c0_i32_0 : i32, i32, i32
  }
}

</mosaic_0001>

<bundles_post_ra>
// kernel: block_forward.1
= control target key start
LH: loop header
LB: loop body
LE: loop exit
PB: predicated region body
PF: predicated region fallthrough
CT: control target
= control target key end

     0   :  { %9 = vsyncpa [#allocation3], 0  ;;  %s1166_s0 = inlined_call_operand.vmem [shape: f32[2,8,32], index: 0, kind: input, shape index: {}]   ;;  %s1167_s1 = inlined_call_operand.vmem [shape: f32[32,384], index: 1, kind: input, shape index: {}]   ;;  %s1168_s2 = inlined_call_operand.vmem [shape: f32[128,32], index: 2, kind: input, shape index: {}]   ;;  %s1169_s3 = inlined_call_operand.vmem [shape: f32[8,256], index: 3, kind: input, shape index: {}]   ;;  %s1170_s4 = inlined_call_operand.hbm [shape: f32[2,8,32], index: 4, kind: output, shape index: {}]  }
   0x1   :  { %11 = vsyncpa [#allocation3 + $0x1], 0  ;;  %s919_s15 = smov 0   ;;  %s921_s16 = smov 0  }
   0x2   :  { %s923_s17 = smov 0   ;;  %s925_s18 = smov 0  }
   0x3 LB: > { %s940_s19 = sadd.s32 4294967295, %s888_s18   ;;  %s731_s20 = sadd.s32 4294967294, %s888_s18   ;;  %s888_s18 = sphi %s925_s18, %s1176_s18   ;;  %s884_s17 = sphi %s923_s17, %s1175_s17   ;;  %s880_s16 = sphi %s921_s16, %s1174_s16   ;;  %s876_s15 = sphi %s919_s15, %s1173_s15  }
   0x4   : > { %s944_s21 = sadd.s32 1, %s888_s18   ;;  %s113_s22 = sadd.s32 1, %s884_s17 }
   0x5   : > { %s110_s23 = ssub.s32 %s888_s18, %s944_s21  ;;  %p123_p0 = scmp.ne.s32.totalorder %s884_s17, %s880_s16 }
   0x6   : > { %p111_p1 = scmp.eq.s32.totalorder %s110_s23, 0  ;;  %p124_p2 = scmp.eq.s32.totalorder %s940_s19, 1 }
   0x7   : > { %p129_p3 = scmp.ne.s32.totalorder %s880_s16, %s876_s15  ;;  %p130_p4 = scmp.eq.s32.totalorder %s731_s20, 1 }
   0x8   : > { %s955_s24 = scalar_select %p111_p1, %s884_s17, %s113_s22  }
   0x9   : > { %p957_p5 = por %p124_p2, %p123_p0  ;;  %p961_p6 = por %p130_p4, %p129_p3 }
   0xa   : > { %p734_p7 = scmp.ge.s32.totalorder %s888_s18, 1  ;;  %p164_p8 = scmp.lt.s32.totalorder %s888_s18, 3 }
   0xc   : > { %p165_p9 = pnand %p734_p7, %p164_p8 }
   0xd   : > { %p189_p10 = scmp.lt.s32.totalorder (!%p165_p9), %s940_s19, 1  ;;  %s891_s7 = smov (!%p165_p9), 120  }
   0xe   : > { %168 = sbr.rel (%p165_p9) target bundleno = 1723 (0x6bb), region = 36  ;;  %s892_s8 = smov (!%p165_p9), 64  }
   0xf   : > { %s893_s11 = smov (!%p165_p9), 112   ;;  %s753_s29 = sshll.u32 (!%p165_p9), %s940_s19, 3 }
  0x10   : > { %s667_s6 = scalar_lea.hbm (!%p165_p9), %s1170_s4, %s753_s29  ;;  %s846_s14 = scalar_lea.hbm (!%p165_p9), %s1170_s4, 16 }
  0x11   : > { %s671_s9 = sshll.u32 (!%p165_p9), %s667_s6, 4  ;;  %s672_s9 = int_to_ptr.hbm [resolvable:$true] %s671_s9 }
  0x13   : > { %s190_s27 = scalar_select %p189_p10, %s940_s19, 1  ;;  %vm224_vm0 = vcmask 261120   ;;  %v890_v2 = vmov 32.0   ;;  %v203_v14 = vld [vmem:[%s1167_s1 + $0x48] sm:$0xff]  ;;  %v204_v15 = vld [vmem:[%s1167_s1 + $0x50] sm:$0xff]  ;;  %v201_v17 = vld [vmem:[%s1167_s1 + $0x38] sm:$0xff] }
  0x14   : > { %804 = vrcp.f32 %v890_v2  ;;  %273 = vmatpush.msra.mxu0 %v203_v14  ;;  %293 = vmatpush.msra.mxu2 %v204_v15  ;;  %v200_v16 = vld [vmem:[%s1167_s1 + $0x30] sm:$0xff]  ;;  %v197_v18 = vld [vmem:[%s1167_s1 + $0x18] sm:$0xff]  ;;  %v198_v19 = vld [vmem:[%s1167_s1 + $0x20] sm:$0xff]  ;;  %vm309_vm5 = vcmask 64512   ;;  %s840_s19 = sshra.s32 %s672_s9, 4  ;;  %s841_s19 = int_to_ptr.hbm [resolvable:$true] %s840_s19 }
  0x15   : > { %s736_s28 = sshll.u32 %s190_s27, 3  ;;  %v194_v20 = vld [vmem:[%s1167_s1] sm:$0xff]  ;;  %v195_v21 = vld [vmem:[%s1167_s1 + $0x8] sm:$0xff]  ;;  %s186_s27 = sand.u32 1, %s880_s16  }
  0x16   : > { %s192_s5 = scalar_lea.vmem %s1166_s0, %s736_s28  ;;  %274 = vmatpush.msra.mxu0 %v200_v16  ;;  %294 = vmatpush.msra.mxu2 %v201_v17  ;;  %v1009_v30 = vld [vmem:[%s1169_s3] sm:$0xff]  ;;  %v207_v47 = vld [vmem:[%s1169_s3 + $0x8] sm:$0xff]  ;;  %s735_s28 = sshll.u32 %s186_s27, 3 }
  0x17   : > { %v972_v0 = vld [vmem:[%s192_s5] sm:$0xff]  ;;  %v254_v32 = vperm.slane %v1009_v30, 1  ;;  %v256_v35 = vperm.slane %v1009_v30, 2  ;;  %s657_s10 = scalar_lea.sflag [#allocation3], %s186_s27  ;;  %p847_p0 = scmp.lt.s32.totalorder %s841_s19, %s1170_s4 }
  0x18   : > { %v225_v1 = vsel %vm224_vm0, %v972_v0, 0.0  ;;  %275 = vmatpush.msra.mxu0 %v197_v18  ;;  %295 = vmatpush.msra.mxu2 %v198_v19 }
  0x19   : > { %226 = vadd.xlane.f32.xlu0 %v225_v1 }
  0x1a   : > { %v805_v3 = vpop.eup %804  ;;  %276 = vmatpush.msra.mxu0 %v194_v20  ;;  %296 = vmatpush.msra.mxu2 %v195_v21 }
  0x1b   : > { %v229_v4 = vmul.f32 32.0, %v805_v3  ;;  %vm233_vm1 = vweird.f32 %v805_v3 }
  0x1d   : > { %v230_v5 = vsub.f32 1.0, %v229_v4 }
  0x1f   : > { %v231_v6 = vmul.f32 %v805_v3, %v230_v5 }
  0x21   : > { %v232_v7 = vadd.f32 %v805_v3, %v231_v6 }
  0x23   : > { %v976_v8 = vsel %vm233_vm1, %v805_v3, %v232_v7 }
  0x8c   : > { %v227_v9 = vpop.xlane.xlu0 %226 }
  0x8d   : > { %v235_v10 = vmul.f32 %v976_v8, %v227_v9 }
  0x8f   : > { %v236_v11 = vsub.f32 %v972_v0, %v235_v10 }
  0x91   : > { %v237_v12 = vmul.f32 %v236_v11, %v236_v11 }
  0x93   : > { %v238_v13 = vsel %vm224_vm0, %v237_v12, 0.0 }
  0x94   : > { %239 = vadd.xlane.f32.xlu0 %v238_v13 }
 0x107   : > { %v240_v22 = vpop.xlane.xlu0 %239 }
 0x108   : > { %v241_v23 = vmul.f32 %v240_v22, %v976_v8 }
 0x10a   : > { %v242_v24 = vadd.f32 1e-05, %v241_v23 }
 0x10c   : > { %806 = vrsqrt.f32 %v242_v24  ;;  %vm249_vm3 = vweird.f32 %v242_v24 }
 0x112   : > { %v807_v25 = vpop.eup %806 }
 0x113   : > { %v244_v26 = vmul.f32 %v807_v25, %v242_v24  ;;  %vm250_vm2 = vweird.f32 %v807_v25 }
 0x114   : > { %vm251_vm4 = vmor %vm249_vm3, %vm250_vm2 }
 0x115   : > { %v245_v27 = vmul.f32 %v807_v25, %v244_v26 }
 0x117   : > { %v246_v28 = vmul.f32 0.5, %v245_v27 }
 0x119   : > { %v247_v29 = vsub.f32 1.5, %v246_v28 }
 0x11b   : > { %v248_v31 = vmul.f32 %v807_v25, %v247_v29 }
 0x11d   : > { %v252_v33 = vsel %vm251_vm4, %v807_v25, %v248_v31 }
 0x11e   : > { %v253_v34 = vmul.f32 %v252_v33, %v236_v11 }
 0x120   : > { %v255_v36 = vmul.f32 %v254_v32, %v253_v34 }
 0x122   : > { %v257_v37 = vadd.f32 %v256_v35, %v255_v36 }
 0x124   : > { %737 = vmatmul.msk.f32.vlgmr.msra.gmra.mxu0 %vm224_vm0, %v257_v37  ;;  %738 = vmatmul.msk.f32.vlgmr.msra.gmra.mxu2 %vm224_vm0, %v257_v37 }
 0x1a1   : > { %v1015_v38 = vpop.f32.mrf.mxu0 }
 0x1a2   : > { %307 = vrot.lane.b32.xlu2 %v1015_v38, %s891_s7  ;;  %302 = vrot.lane.b32.xlu1 %v1015_v38, %s892_s8 }
 0x1a7   : > { %v1019_v39 = vpop.f32.mrf.mxu2 }
 0x1a8   : > { %360 = vrot.lane.b32.xlu0 %v1019_v39, %s891_s7 }
 0x1aa   : > { %305 = vrot.lane.b32.xlu1 %v1019_v39, %s892_s8 }
 0x1fc   : > { %v308_v40 = vpop.permute.xlu2 %307 }
 0x1fd   : > { %739 = vmatpush.xpose.msk.msrb.mxu2 %vm309_vm5, %v308_v40 }
 0x200   : > { %740 = vmatmul.msk.f32.vlgmr.msrb.gmra.mxu2 %vm309_vm5, %v1015_v38 }
 0x214   : > { %v303_v41 = vpop.permute.xlu1 %302 }
 0x215   : > { %334 = vrot.lane.b32.xlu2 %v303_v41, %s891_s7 }
 0x21a   : > { %v361_v42 = vpop.permute.xlu0 %360 }
 0x21b   : > { %743 = vmatpush.xpose.msk.msra.mxu2 %vm309_vm5, %v361_v42 }
 0x21c   : > { %v306_v43 = vpop.permute.xlu1 %305 }
 0x21d   : > { %386 = vrot.lane.b32.xlu1 %v306_v43, %s891_s7  ;;  %v799_v18 = vpack.i.bf16 %v306_v43, %v1019_v39  ;;  %s188_s7 = scalar_lea.vmem [#allocation2], %s735_s28 }
 0x21e   : > { %744 = vmatmul.msk.f32.vlgmr.msra.gmra.mxu2 %vm309_vm5, %v1019_v39  ;;  %s669_s8 = sshll.u32 %s188_s7, 4  ;;  %s670_s8 = int_to_ptr.vmem [resolvable:$true] %s669_s8 }
 0x26f   : > { %v335_v44 = vpop.permute.xlu2 %334 }
 0x270   : > { %741 = vmatpush.xpose.msk.msra.mxu3 %vm309_vm5, %v335_v44 }
 0x273   : > { %742 = vmatmul.msk.f32.vlgmr.msra.gmra.mxu3 %vm309_vm5, %v303_v41 }
 0x283   : > { %v331_v46 = vpop.f32.mrf.mxu2 }
 0x284   : > { %v332_v54 = vadd.f32 %v331_v46, %v207_v47 }
 0x286   : > { %v412_v55 = vsel %vm309_vm5, %v332_v54, -inf }
 0x28f   : > { %v387_v45 = vpop.permute.xlu1 %386 }
 0x290   : > { %745 = vmatpush.xpose.msk.msrb.mxu3 %vm309_vm5, %v387_v45 }
 0x293   : > { %746 = vmatmul.msk.f32.vlgmr.msrb.gmra.mxu3 %vm309_vm5, %v306_v43 }
 0x2a1   : > { %v383_v48 = vpop.f32.mrf.mxu2 }
 0x2a2   : > { %v384_v49 = vadd.f32 %v383_v48, %v207_v47 }
 0x2a4   : > { %v418_v50 = vsel %vm309_vm5, %v384_v49, -inf }
 0x2a5   : > { %419 = vmax.xlane.f32.xlu1 %v418_v50 }
 0x2f6   : > { %v357_v51 = vpop.f32.mrf.mxu3 }
 0x2f7   : > { %v358_v52 = vadd.f32 %v357_v51, %v207_v47 }
 0x2f9   : > { %v415_v53 = vsel %vm309_vm5, %v358_v52, -inf }
 0x2fa   : > { %416 = vmax.xlane.f32.xlu2 %v415_v53 }
 0x302   : > { %413 = vmax.xlane.f32.xlu2 %v412_v55 }
 0x316   : > { %v409_v56 = vpop.f32.mrf.mxu3 }
 0x317   : > { %v410_v57 = vadd.f32 %v409_v56, %v207_v47 }
 0x318   : > { %v420_v62 = vpop.xlane.xlu1 %419 }
 0x319   : > { %v421_v58 = vsel %vm309_vm5, %v410_v57, -inf  ;;  %v426_v3 = vsub.f32 %v384_v49, %v420_v62 }
 0x31a   : > { %422 = vmax.xlane.f32.xlu0 %v421_v58 }
 0x31b   : > { %v432_v6 = vmul.f32 1.442695, %v426_v3 }
 0x32e   : > { %494 = vrot.lane.b32.xlu0 %v303_v41, %s893_s11 }
 0x36d   : > { %v417_v59 = vpop.xlane.xlu2 %416 }
 0x36e   : > { %v425_v60 = vsub.f32 %v358_v52, %v417_v59  ;;  %v580_v59 = vperm.slane %v1009_v30, 5 }
 0x370   : > { %v430_v61 = vmul.f32 1.442695, %v425_v60 }
 0x372   : > { %808 = vpow2.f32 %v430_v61 }
 0x375   : > { %v414_v63 = vpop.xlane.xlu2 %413 }
 0x376   : > { %v424_v1 = vsub.f32 %v332_v54, %v414_v63 }
 0x378   : > { %v809_v2 = vpop.eup %808  ;;  %v428_v4 = vmul.f32 1.442695, %v424_v1 }
 0x379   : > { %v439_v5 = vsel %vm309_vm5, %v809_v2, 0.0 }
 0x37a   : > { %810 = vpow2.f32 %v428_v4  ;;  %440 = vadd.xlane.f32.xlu2 %v439_v5  ;;  %v205_v5 = vld [vmem:[%s1167_s1 + $0x58] sm:$0xff] }
 0x37b   : > { %812 = vpow2.f32 %v432_v6  ;;  %v199_v6 = vld [vmem:[%s1167_s1 + $0x28] sm:$0xff] }
 0x380   : > { %v811_v7 = vpop.eup %810 }
 0x381   : > { %v436_v9 = vsel %vm309_vm5, %v811_v7, 0.0  ;;  %v813_v10 = vpop.eup %812 }
 0x382   : > { %437 = vadd.xlane.f32.xlu1 %v436_v9  ;;  %v442_v11 = vsel %vm309_vm5, %v813_v10, 0.0  ;;  %v223_v9 = vld [vmem:[%s1168_s2 + $0x78] sm:$0xff] }
 0x383   : > { %634 = vmatpush.msra.mxu1 %v223_v9 }
 0x38a   : > { %443 = vadd.xlane.f32.xlu1 %v442_v11  ;;  %v221_v11 = vld [vmem:[%s1168_s2 + $0x68] sm:$0xff] }
 0x38d   : > { %v423_v12 = vpop.xlane.xlu0 %422 }
 0x38e   : > { %v427_v13 = vsub.f32 %v410_v57, %v423_v12 }
 0x390   : > { %v434_v14 = vmul.f32 1.442695, %v427_v13 }
 0x392   : > { %814 = vpow2.f32 %v434_v14  ;;  %v220_v14 = vld [vmem:[%s1168_s2 + $0x60] sm:$0xff] }
 0x398   : > { %v815_v15 = vpop.eup %814 }
 0x399   : > { %v445_v16 = vsel %vm309_vm5, %v815_v15, 0.0 }
 0x39a   : > { %446 = vadd.xlane.f32.xlu2 %v445_v16  ;;  %v219_v16 = vld [vmem:[%s1168_s2 + $0x58] sm:$0xff] }
 0x3a0   : > { %v495_v17 = vpop.permute.xlu0 %494 }
 0x3a1   : > { %515 = vmatpush.msra.mxu3 %v495_v17  ;;  %v218_v17 = vld [vmem:[%s1168_s2 + $0x50] sm:$0xff] }
 0x3a3   : > { %468 = vrot.lane.b32.xlu1 %v1015_v38, %s893_s11 }
 0x3b2   : > { %800 = vrot.lane.b32.xlu2 %v799_v18, %s893_s11  ;;  %v216_v18 = vld [vmem:[%s1168_s2 + $0x40] sm:$0xff]  ;;  %s842_s11 = scalar_lea.hbm %s841_s19, 8 }
 0x3b3   : > { %p843_p11 = scmp.ne.s32.totalorder %s841_s19, %s842_s11  ;;  %p848_p1 = scmp.lt.s32.totalorder %s846_s14, %s842_s11 }
 0x3b5   : > { %p844_p12 = pnand %p843_p11, %p957_p5  ;;  %p849_p2 = por %p848_p1, %p847_p0 }
 0x3b7   : > { %p845_p13 = pneg %p844_p12 }
 0x3b9   : > { %p850_p3 = pnand %p849_p2, %p845_p13 }
 0x3ed   : > { %v441_v19 = vpop.xlane.xlu2 %440 }
 0x3ee   : > { %816 = vrcp.f32 %v441_v19 }
 0x3f4   : > { %v817_v20 = vpop.eup %816 }
 0x3f5   : > { %v453_v21 = vmul.f32 %v817_v20, %v441_v19  ;;  %v438_v22 = vpop.xlane.xlu1 %437 }
 0x3f6   : > { %818 = vrcp.f32 %v438_v22 }
 0x3f7   : > { %v457_v23 = vsub.f32 2.0, %v453_v21 }
 0x3f9   : > { %v461_v24 = vmul.f32 %v817_v20, %v457_v23  ;;  %v215_v20 = vld [vmem:[%s1168_s2 + $0x38] sm:$0xff] }
 0x3fb   : > { %v465_v25 = vmul.f32 %v809_v2, %v461_v24  ;;  %v213_v24 = vld [vmem:[%s1168_s2 + $0x28] sm:$0xff] }
 0x3fc   : > { %v819_v27 = vpop.eup %818 }
 0x3fd   : > { %748 = vmatmul.msk.f32.vlgmr.msra.gmra.mxu3 %vm309_vm5, %v465_v25  ;;  %v444_v26 = vpop.xlane.xlu1 %443  ;;  %v452_v29 = vmul.f32 %v819_v27, %v438_v22  ;;  %v214_v22 = vld [vmem:[%s1168_s2 + $0x30] sm:$0xff] }
 0x3fe   : > { %820 = vrcp.f32 %v444_v26 }
 0x3ff   : > { %v456_v32 = vsub.f32 2.0, %v452_v29 }
 0x401   : > { %v460_v35 = vmul.f32 %v819_v27, %v456_v32 }
 0x403   : > { %v464_v38 = vmul.f32 %v811_v7, %v460_v35  ;;  %v196_v7 = vld [vmem:[%s1167_s1 + $0x10] sm:$0xff] }
 0x404   : > { %v821_v28 = vpop.eup %820 }
 0x405   : > { %v454_v31 = vmul.f32 %v821_v28, %v444_v26  ;;  %v212_v26 = vld [vmem:[%s1168_s2 + $0x20] sm:$0xff] }
 0x407   : > { %v458_v34 = vsub.f32 2.0, %v454_v31  ;;  %v604_v31 = vperm.slane %v1009_v30, 3 }
 0x409   : > { %v462_v36 = vmul.f32 %v821_v28, %v458_v34  ;;  %v211_v28 = vld [vmem:[%s1168_s2 + $0x18] sm:$0xff]  ;;  %v606_v34 = vperm.slane %v1009_v30, 4 }
 0x40b   : > { %v466_v44 = vmul.f32 %v813_v10, %v462_v36  ;;  %v222_v10 = vld [vmem:[%s1168_s2 + $0x70] sm:$0xff] }
 0x40c   : > { %635 = vmatpush.msra.mxu1 %v222_v10 }
 0x40d   : > { %v447_v33 = vpop.xlane.xlu2 %446 }
 0x40e   : > { %822 = vrcp.f32 %v447_v33  ;;  %636 = vmatpush.msra.mxu1 %v221_v11 }
 0x410   : > { %637 = vmatpush.msra.mxu1 %v220_v14 }
 0x412   : > { %638 = vmatpush.msra.mxu1 %v219_v16 }
 0x414   : > { %v823_v37 = vpop.eup %822  ;;  %639 = vmatpush.msra.mxu1 %v218_v17 }
 0x415   : > { %v455_v39 = vmul.f32 %v823_v37, %v447_v33  ;;  %v801_v40 = vpop.permute.xlu2 %800  ;;  %v469_v41 = vpop.permute.xlu1 %468 }
 0x416   : > { %v803_v42 = vunpack.i.h.bf16 %v801_v40  ;;  %v802_v43 = vunpack.i.l.bf16 %v801_v40  ;;  %489 = vmatpush.msrb.mxu0 %v469_v41  ;;  %v608_v40 = vperm.slane %v1009_v30, 0 }
 0x417   : > { %v459_v45 = vsub.f32 2.0, %v455_v39  ;;  %747 = vmatmul.msk.f32.vlgmr.msrb.gmra.mxu0 %vm309_vm5, %v464_v38  ;;  %v209_v38 = vld [vmem:[%s1168_s2 + $0x8] sm:$0xff]  ;;  %v208_v39 = vld [vmem:[%s1168_s2] sm:$0xff] }
 0x418   : > { %541 = vmatpush.msrb.mxu2 %v802_v43  ;;  %567 = vmatpush.msrb.mxu3 %v803_v42 }
 0x419   : > { %v463_v46 = vmul.f32 %v823_v37, %v459_v45  ;;  %749 = vmatmul.msk.f32.vlgmr.msrb.gmra.mxu2 %vm309_vm5, %v466_v44  ;;  %624 = vmatpush.msra.mxu0 %v205_v5  ;;  %v210_v37 = vld [vmem:[%s1168_s2 + $0x10] sm:$0xff]  ;;  %v633_v44 = vperm.slane %v1009_v30, 6 }
 0x41b   : > { %v467_v47 = vmul.f32 %v815_v15, %v463_v46 }
 0x41d   : > { %750 = vmatmul.msk.f32.vlgmr.msrb.gmra.mxu3 %vm309_vm5, %v467_v47 }
 0x480   : > { %v517_v48 = vpop.f32.mrf.mxu3 }
 0x481   : > { %v573_v52 = vsel %vm224_vm0, %v517_v48, 0.0 }
 0x494   : > { %v491_v49 = vpop.f32.mrf.mxu0 }
 0x495   : > { %v572_v50 = vsel %vm224_vm0, %v491_v49, 0.0 }
 0x496   : > { %v574_v54 = vadd.f32 %v573_v52, %v572_v50 }
 0x49c   : > { %v543_v51 = vpop.f32.mrf.mxu2 }
 0x49d   : > { %v575_v53 = vsel %vm224_vm0, %v543_v51, 0.0 }
 0x49e   : > { %v576_v55 = vadd.f32 %v575_v53, %v574_v54 }
 0x4a0   : > { %v569_v56 = vpop.f32.mrf.mxu3 }
 0x4a1   : > { %v577_v57 = vsel %vm224_vm0, %v569_v56, 0.0 }
 0x4a2   : > { %v578_v58 = vadd.f32 %v577_v57, %v576_v55 }
 0x4a4   : > { %v579_v60 = vadd.f32 %v578_v58, %v972_v0  ;;  %v202_v0 = vld [vmem:[%s1167_s1 + $0x40] sm:$0xff] }
 0x4a5   : > { %625 = vmatpush.msra.mxu0 %v202_v0 }
 0x4a6   : > { %v1059_v61 = vadd.f32 %v580_v59, %v579_v60 }
 0x4a7   : > { %626 = vmatpush.msra.mxu0 %v199_v6 }
 0x4a8   : > { %v582_v62 = vsel %vm224_vm0, %v1059_v61, 0.0 }
 0x4a9   : > { %583 = vadd.xlane.f32.xlu0 %v582_v62  ;;  %627 = vmatpush.msra.mxu0 %v196_v7 }
 0x51c   : > { %v584_v63 = vpop.xlane.xlu0 %583 }
 0x51d   : > { %v585_v1 = vmul.f32 %v584_v63, %v976_v8 }
 0x51f   : > { %v586_v2 = vsub.f32 %v1059_v61, %v585_v1 }
 0x521   : > { %v587_v3 = vmul.f32 %v586_v2, %v586_v2 }
 0x523   : > { %v588_v4 = vsel %vm224_vm0, %v587_v3, 0.0 }
 0x524   : > { %589 = vadd.xlane.f32.xlu2 %v588_v4 }
 0x597   : > { %v590_v12 = vpop.xlane.xlu2 %589 }
 0x598   : > { %v591_v13 = vmul.f32 %v590_v12, %v976_v8  ;;  %v217_v8 = vld [vmem:[%s1168_s2 + $0x48] sm:$0xff] }
 0x599   : > { %640 = vmatpush.msra.mxu1 %v217_v8 }
 0x59a   : > { %v592_v15 = vadd.f32 1e-05, %v591_v13 }
 0x59b   : > { %641 = vmatpush.msra.mxu1 %v216_v18 }
 0x59c   : > { %824 = vrsqrt.f32 %v592_v15  ;;  %vm599_vm7 = vweird.f32 %v592_v15 }
 0x59d   : > { %642 = vmatpush.msra.mxu1 %v215_v20 }
 0x59f   : > { %643 = vmatpush.msra.mxu1 %v214_v22 }
 0x5a1   : > { %644 = vmatpush.msra.mxu1 %v213_v24 }
 0x5a2   : > { %v825_v19 = vpop.eup %824 }
 0x5a3   : > { %v594_v21 = vmul.f32 %v825_v19, %v592_v15  ;;  %vm600_vm6 = vweird.f32 %v825_v19  ;;  %645 = vmatpush.msra.mxu1 %v212_v26 }
 0x5a4   : > { %vm601_vm8 = vmor %vm599_vm7, %vm600_vm6 }
 0x5a5   : > { %v595_v23 = vmul.f32 %v825_v19, %v594_v21  ;;  %646 = vmatpush.msra.mxu1 %v211_v28 }
 0x5a7   : > { %v596_v25 = vmul.f32 0.5, %v595_v23  ;;  %647 = vmatpush.msra.mxu1 %v210_v37 }
 0x5a9   : > { %v597_v27 = vsub.f32 1.5, %v596_v25  ;;  %648 = vmatpush.msra.mxu1 %v209_v38 }
 0x5ab   : > { %v598_v29 = vmul.f32 %v825_v19, %v597_v27  ;;  %649 = vmatpush.msra.mxu1 %v208_v39 }
 0x5ad   : > { %v602_v32 = vsel %vm601_vm8, %v825_v19, %v598_v29 }
 0x5ae   : > { %v603_v33 = vmul.f32 %v602_v32, %v586_v2 }
 0x5b0   : > { %v605_v35 = vmul.f32 %v604_v31, %v603_v33 }
 0x5b2   : > { %v607_v36 = vadd.f32 %v606_v34, %v605_v35 }
 0x5b4   : > { %751 = vmatmul.msk.f32.vlgmr.msra.gmra.mxu0 %vm224_vm0, %v607_v36 }
 0x631   : > { %v629_v41 = vpop.f32.mrf.mxu0 }
 0x632   : > { %v630_v42 = vadd.f32 %v629_v41, %v608_v40 }
 0x634   : > { %v632_v43 = vmax.f32 %v630_v42, 0.0 }
 0x636   : > { %650 = vmatmul.f32.vlgmr.msra.gmra.mxu1 %v632_v43 }
 0x6b3   : > { %v651_v45 = vpop.f32.mrf.mxu1 }
 0x6b4   : > { %v652_v46 = vadd.f32 %v651_v45, %v633_v44 }
 0x6b6   : > { %v654_v47 = vadd.f32 %v652_v46, %v1059_v61 }
 0x6b8   : > { %655 = vst.msk [vmem:[%s188_s7] sm:$0xff] %vm224_vm0, %v654_v47 }
 0x6b9   : > { %853 = shalt.err (!%p850_p3)
}
 0x6ba   : > { %756 = dma.vmem_to_hbm [thread:$0]  (%p957_p5), %s670_s8, 128, %s672_s9, %s657_s10  }
 0x6bb PF: > { %p762_p4 = scmp.ge.s32.totalorder %s888_s18, 2  ;;  %s683_s23 = sand.u32 1, %s876_s15  }
 0x6bc   : > { %s684_s27 = scalar_lea.sflag [#allocation3], %s683_s23 }
 0x6bd   : > { %p759_p7 = pnand %p762_p4, %p961_p6 }
 0x6bf   : > { %p760_p8 = pneg %p759_p7 }
 0x6c1   : > { %871 = dma.done.wait (%p760_p8), %s684_s27, 128  }
 0x6c2   : > { %873 = vsyncadd (%p760_p8), %s684_s27, 4294967168  ;;  %p14_p9 = scmp.ge.s32.totalorder %s944_s21, 4   ;;  %s1173_s15 = smov %s880_s16 }
 0x6c3   : > { %s1174_s16 = smov %s884_s17  ;;  %s1175_s17 = smov %s955_s24 }
 0x6c4   : > { %s1176_s18 = smov %s944_s21  ;;  %16 = sbr.rel (!%p14_p9) target bundleno = 3 (0x3), region = 71 }
 0x6c9   :  { %690 = vsyncpa [#allocation3], 1 }
 0x6ca   :  { %692 = vsyncpa [#allocation3 + $0x1], 1 }

</bundles_post_ra>
